<compile_context>
chip_gen: v7x
topology: tpu7x:2x2x1
jax: 0.10.0
libtpu: 0.0.40
codegen_flags: <defaults>
</compile_context>

<pallas_src>
import jax
import jax.numpy as jnp
from jax.experimental import pallas as pl
from jax.experimental.pallas import tpu as pltpu


def _f2c_kernel(x_ref, w_ref, b_ref, o_ref, acc_ref):
    # x_ref: [TN, C, T_HW]   w_ref: [C, Kp]   b_ref: [1, Kp]
    # o_ref: [TN, Kp]        acc_ref (scratch): [TN, C, LW] f32 lane-partials
    s = pl.program_id(1)
    tn, c, t_hw = x_ref.shape
    lw = acc_ref.shape[-1]
    n_grp = t_hw // lw

    # Lane-partial sum of this HW chunk: add LW-wide lane groups elementwise.
    # Static-slice loads at 128-lane boundaries + VPU adds only (no XLU work,
    # no relayout); accumulate in f32 for precision with bf16 inputs.
    part = x_ref[:, :, pl.ds(0, lw)].astype(jnp.float32)
    for j in range(1, n_grp):
        part = part + x_ref[:, :, pl.ds(j * lw, lw)].astype(jnp.float32)

    @pl.when(s == 0)
    def _():
        acc_ref[...] = part          # init from first chunk; no zero-fill pass

    @pl.when(s != 0)
    def _():
        acc_ref[...] += part

    @pl.when(s == pl.num_programs(1) - 1)
    def _():
        # One cross-lane reduce + relayout per batch tile, then MXU matmul in
        # the stored weight dtype (no materialized f32 upcast of [C, Kp]).
        pooled = jnp.sum(acc_ref[...], axis=-1)                  # [TN, C]
        out = jnp.dot(pooled.astype(w_ref.dtype), w_ref[...],
                      preferred_element_type=jnp.float32)        # [TN, Kp]
        out = out + b_ref[...]
        o_ref[...] = out.astype(o_ref.dtype)


def _vmem_capacity_bytes(default=64 * 1024 * 1024):
    """Generation-aware VMEM capacity (v5e/v6e: 128 MiB, v7x: 64 MiB/TC)."""
    try:
        info = pltpu.get_tpu_info()
        cap = getattr(info, "vmem_capacity_bytes", None)
        if cap:
            return int(cap)
    except Exception:
        pass
    return default  # conservative: the smallest VMEM of supported generations


def _pick_tiles(N, C, HW, x_item, out_item, Kp, w_item, vmem_limit):
    """Pick (TN, T_HW, LW) so 2*x_tile + acc + weight + 2*out fits vmem_limit,
    respecting the dtype-aware (sublane, 128) block constraints."""
    # Dtype-aware sublane multiple for TN (out block's second-to-last dim):
    # 8 for f32, 16 for bf16, 32 for int8/fp8 (unless TN == full N).
    sub = max(8, 32 // max(1, out_item))

    if HW % 128 == 0:
        lw = 128
        # Multiples of 128 dividing HW; cap the in-kernel unroll at 16 groups.
        hw_cands = sorted(
            (m for m in range(128, min(HW, 16 * 128) + 1, 128) if HW % m == 0),
            reverse=True)
    else:
        lw = HW                      # single reduction step; acc holds full HW
        hw_cands = [HW]

    tn_cands = [m for m in range(sub, N + 1, sub) if N % m == 0]
    if N not in tn_cands:
        tn_cands.append(N)
    # Prefer >=2 steps on the parallel batch axis when N allows it, so v7x's
    # two TensorCores both get work (negligible cost on 1-TC v5e/v6e).
    multi = [t for t in tn_cands if N // t >= 2]
    tn_cands = sorted(multi if multi else tn_cands, reverse=True)

    resident = 2 * C * Kp * w_item + 2 * Kp * w_item   # weight+bias (conservative 2x)
    budget = int(vmem_limit * 0.85)
    for t_hw in hw_cands:
        for tn in tn_cands:
            tot = (resident
                   + 2 * tn * C * t_hw * x_item        # double-buffered x tile
                   + tn * C * lw * 4                   # lane-partial f32 acc
                   + 2 * tn * Kp * out_item)           # double-buffered out
            if tot <= budget:
                return tn, t_hw, lw
    return min(tn_cands), min(hw_cands), lw            # smallest legal combo


def feature2class(x, weight, bias):
    """x: [N, C, H, W] (NCHW). weight: [K, C] (PyTorch Linear). bias: [K]."""
    N, C, H, W = x.shape
    K = weight.shape[0]
    HW = H * W

    # Glue reshape (layout plumbing only): spatial (reduction) axis last (lanes).
    x3 = x.reshape(N, C, HW)

    # Fold the 1/(H*W) mean scale into the transposed weight, computed in f32
    # and cast once; pad K to a lane-dense multiple of 128.
    Kp = max(128, ((K + 127) // 128) * 128)
    w_t = (weight.astype(jnp.float32).T * (1.0 / HW)).astype(weight.dtype)  # [C, K]
    w_p = jnp.zeros((C, Kp), dtype=weight.dtype).at[:, :K].set(w_t)
    b_p = jnp.zeros((1, Kp), dtype=bias.dtype).at[0, :K].set(bias)

    x_item = jnp.dtype(x.dtype).itemsize
    out_item = x_item
    w_item = jnp.dtype(weight.dtype).itemsize

    vmem_cap = _vmem_capacity_bytes()
    vmem_limit = int(vmem_cap * 3 // 4)   # 96 MiB on v5e/v6e, 48 MiB on v7x

    TN, T_HW, LW = _pick_tiles(N, C, HW, x_item, out_item, Kp, w_item, vmem_limit)
    grid = (N // TN, HW // T_HW)          # reduction (HW) axis last

    def run(single_buffer_consts):
        const_kw = {"pipeline_mode": pl.Buffered(1)} if single_buffer_consts else {}
        return pl.pallas_call(
            _f2c_kernel,
            out_shape=jax.ShapeDtypeStruct((N, Kp), x.dtype),
            grid_spec=pltpu.PrefetchScalarGridSpec(
                num_scalar_prefetch=0,
                grid=grid,
                in_specs=[
                    pl.BlockSpec((TN, C, T_HW), lambda n, s: (n, 0, s)),       # streamed x
                    pl.BlockSpec((C, Kp), lambda n, s: (0, 0), **const_kw),    # resident weight
                    pl.BlockSpec((1, Kp), lambda n, s: (0, 0), **const_kw),    # resident bias
                ],
                out_specs=pl.BlockSpec((TN, Kp), lambda n, s: (n, 0)),
                scratch_shapes=[pltpu.VMEM((TN, C, LW), jnp.float32)],         # lane-partial acc
            ),
            compiler_params=pltpu.CompilerParams(
                dimension_semantics=("parallel", "arbitrary"),
                vmem_limit_bytes=vmem_limit,
            ),
        )(x3, w_p, b_p)

    try:
        out_p = run(True)
    except Exception:
        # pipeline_mode=pl.Buffered(1) not supported by this jax/libtpu build:
        # fall back to default double-buffered resident weight/bias (identical
        # semantics; only costs one extra [C, Kp] VMEM buffer).
        out_p = run(False)

    return out_p[:, :K]


if __name__ == "__main__":
    # Small, deterministic synthetic setup consistent with the module:
    #   feature map [N=2, C=32, H=16, W=16], Linear: 32 -> 16 classes.
    key = jax.random.PRNGKey(0)
    kx, kw, kb = jax.random.split(key, 3)

    N, C, H, W, K = 2, 32, 16, 16, 16
    x = jax.random.normal(kx, (N, C, H, W), dtype=jnp.float32)
    weight = jax.random.normal(kw, (K, C), dtype=jnp.float32) * 0.05  # PyTorch Linear [out, in]
    bias = jax.random.normal(kb, (K,), dtype=jnp.float32) * 0.05

    out = feature2class(x, weight, bias)
    out = jax.block_until_ready(out)

    # Pure-JAX reference (AdaptiveAvgPool2d((1,1)) -> flatten -> Linear).
    ref = jnp.mean(x, axis=(2, 3)) @ weight.T + bias
    assert out.shape == (N, K)
    assert jnp.allclose(out, ref, atol=1e-5, rtol=1e-5), "mismatch vs reference"

    print("KERNEL_OK")
</pallas_src>

<mosaic_0001>
module attributes {stable_mosaic.version = 11 : i64} {
  func.func @_f2c_kernel(%arg0: i32, %arg1: i32, %arg2: memref<2x32x256xf32, #tpu.memory_space<vmem>>, %arg3: memref<32x128xf32, #tpu.memory_space<vmem>>, %arg4: memref<1x128xf32, #tpu.memory_space<vmem>>, %arg5: memref<2x128xf32, #tpu.memory_space<vmem>>, %arg6: memref<2x32x128xf32, #tpu.memory_space<vmem>>) attributes {dimension_semantics = [#tpu.dimension_semantics<parallel>, #tpu.dimension_semantics<arbitrary>], iteration_bounds = array<i64: 1, 1>, scalar_prefetch = 0 : i64, scratch_operands = 1 : i64, tpu.core_type = #tpu.core_type<tc>, window_params = [{transform_indices = @transform_0, window_bounds = array<i64: 2, 32, 256>}, {pipeline_mode = #tpu.pipeline_mode<synchronous>, transform_indices = @transform_1, window_bounds = array<i64: 32, 128>}, {pipeline_mode = #tpu.pipeline_mode<synchronous>, transform_indices = @transform_2, window_bounds = array<i64: 1, 128>}, {transform_indices = @transform_3, window_bounds = array<i64: 2, 128>}]} {
    %c0 = arith.constant 0 : index
    %c0_0 = arith.constant 0 : index
    %c0_1 = arith.constant 0 : index
    %0 = vector.load %arg2[%c0, %c0_0, %c0_1] : memref<2x32x256xf32, #tpu.memory_space<vmem>>, vector<2x32x128xf32>
    %c0_2 = arith.constant 0 : index
    %c0_3 = arith.constant 0 : index
    %c128 = arith.constant 128 : index
    %1 = vector.load %arg2[%c0_2, %c0_3, %c128] : memref<2x32x256xf32, #tpu.memory_space<vmem>>, vector<2x32x128xf32>
    %2 = arith.addf %0, %1 : vector<2x32x128xf32>
    %c0_i32 = arith.constant 0 : i32
    %3 = arith.cmpi eq, %arg1, %c0_i32 : i32
    %4 = arith.extui %3 : i1 to i32
    %c0_i32_4 = arith.constant 0 : i32
    %5 = arith.cmpi ne, %4, %c0_i32_4 : i32
    scf.if %5 {
      %c0_9 = arith.constant 0 : index
      %c0_10 = arith.constant 0 : index
      %c0_11 = arith.constant 0 : index
      %12 = vector.load %arg6[%c0_9, %c0_10, %c0_11] : memref<2x32x128xf32, #tpu.memory_space<vmem>>, vector<2x32x128xf32>
      tpu.vector_store %arg6[%c0_9, %c0_10, %c0_11], %2 {strides = array<i32>} : memref<2x32x128xf32, #tpu.memory_space<vmem>>, vector<2x32x128xf32>,
    } else {
    }
    %c0_i32_5 = arith.constant 0 : i32
    %6 = arith.cmpi ne, %arg1, %c0_i32_5 : i32
    %7 = arith.extui %6 : i1 to i32
    %c0_i32_6 = arith.constant 0 : i32
    %8 = arith.cmpi ne, %7, %c0_i32_6 : i32
    scf.if %8 {
      %c0_9 = arith.constant 0 : index
      %c0_10 = arith.constant 0 : index
      %c0_11 = arith.constant 0 : index
      %12 = vector.load %arg6[%c0_9, %c0_10, %c0_11] : memref<2x32x128xf32, #tpu.memory_space<vmem>>, vector<2x32x128xf32>
      %13 = arith.addf %12, %2 : vector<2x32x128xf32>
      %c0_12 = arith.constant 0 : index
      %c0_13 = arith.constant 0 : index
      %c0_14 = arith.constant 0 : index
      %14 = vector.load %arg6[%c0_12, %c0_13, %c0_14] : memref<2x32x128xf32, #tpu.memory_space<vmem>>, vector<2x32x128xf32>
      tpu.vector_store %arg6[%c0_12, %c0_13, %c0_14], %13 {strides = array<i32>} : memref<2x32x128xf32, #tpu.memory_space<vmem>>, vector<2x32x128xf32>,
    } else {
    }
    %c0_i32_7 = arith.constant 0 : i32
    %9 = arith.cmpi eq, %arg1, %c0_i32_7 : i32
    %10 = arith.extui %9 : i1 to i32
    %c0_i32_8 = arith.constant 0 : i32
    %11 = arith.cmpi ne, %10, %c0_i32_8 : i32
    scf.if %11 {
      %c0_9 = arith.constant 0 : index
      %c0_10 = arith.constant 0 : index
      %c0_11 = arith.constant 0 : index
      %12 = vector.load %arg6[%c0_9, %c0_10, %c0_11] : memref<2x32x128xf32, #tpu.memory_space<vmem>>, vector<2x32x128xf32>
      %cst = arith.constant dense<0.000000e+00> : vector<2x32xf32>
      %13 = vector.multi_reduction <add>, %12, %cst [2] : vector<2x32x128xf32> to vector<2x32xf32>
      %c0_12 = arith.constant 0 : index
      %c0_13 = arith.constant 0 : index
      %14 = vector.load %arg3[%c0_12, %c0_13] : memref<32x128xf32, #tpu.memory_space<vmem>>, vector<32x128xf32>
      %cst_14 = arith.constant dense<0.000000e+00> : vector<2x128xf32>
      %15 = tpu.matmul %13, %14, %cst_14 {dimension_numbers = #tpu.dot_dimension_numbers<[1], [0], [0], [1], [0, 0, 1, 1], [], []>} : vector<2x32xf32>, vector<32x128xf32>, vector<2x128xf32> -> vector<2x128xf32>
      %c0_15 = arith.constant 0 : index
      %c0_16 = arith.constant 0 : index
      %16 = vector.load %arg4[%c0_15, %c0_16] : memref<1x128xf32, #tpu.memory_space<vmem>>, vector<1x128xf32>
      %17 = vector.broadcast %16 : vector<1x128xf32> to vector<2x128xf32>
      %18 = arith.addf %15, %17 : vector<2x128xf32>
      %c0_17 = arith.constant 0 : index
      %c0_18 = arith.constant 0 : index
      %19 = vector.load %arg5[%c0_17, %c0_18] : memref<2x128xf32, #tpu.memory_space<vmem>>, vector<2x128xf32>
      tpu.vector_store %arg5[%c0_17, %c0_18], %18 {strides = array<i32>} : memref<2x128xf32, #tpu.memory_space<vmem>>, vector<2x128xf32>,
    } else {
    }
    return
  }
  func.func @transform_0(%arg0: i32, %arg1: i32) -> (i32, i32, i32) {
    %c0_i32 = arith.constant 0 : i32
    %c0_i32_0 = arith.constant 0 : i32
    return %arg0, %c0_i32, %arg1 : i32, i32, i32
  }
  func.func @transform_1(%arg0: i32, %arg1: i32) -> (i32, i32) {
    %c0_i32 = arith.constant 0 : i32
    %c0_i32_0 = arith.constant 0 : i32
    %c0_i32_1 = arith.constant 0 : i32
    return %c0_i32, %c0_i32_0 : i32, i32
  }
  func.func @transform_2(%arg0: i32, %arg1: i32) -> (i32, i32) {
    %c0_i32 = arith.constant 0 : i32
    %c0_i32_0 = arith.constant 0 : i32
    %c0_i32_1 = arith.constant 0 : i32
    return %c0_i32, %c0_i32_0 : i32, i32
  }
  func.func @transform_3(%arg0: i32, %arg1: i32) -> (i32, i32) {
    %c0_i32 = arith.constant 0 : i32
    %c0_i32_0 = arith.constant 0 : i32
    return %arg0, %c0_i32 : i32, i32
  }
}

module attributes {stable_mosaic.version = 11 : i64} {
  func.func @_f2c_kernel(%arg0: i32, %arg1: i32, %arg2: memref<2x32x256xf32, #tpu.memory_space<vmem>>, %arg3: memref<32x128xf32, #tpu.memory_space<vmem>>, %arg4: memref<1x128xf32, #tpu.memory_space<vmem>>, %arg5: memref<2x128xf32, #tpu.memory_space<vmem>>, %arg6: memref<2x32x128xf32, #tpu.memory_space<vmem>>) attributes {dimension_semantics = [#tpu.dimension_semantics<parallel>, #tpu.dimension_semantics<arbitrary>], iteration_bounds = array<i64: 1, 1>, scalar_prefetch = 0 : i64, scratch_operands = 1 : i64, tpu.core_type = #tpu.core_type<tc>, window_params = [{transform_indices = @transform_0, window_bounds = array<i64: 2, 32, 256>}, {pipeline_mode = #tpu.pipeline_mode<synchronous>, transform_indices = @transform_1, window_bounds = array<i64: 32, 128>}, {pipeline_mode = #tpu.pipeline_mode<synchronous>, transform_indices = @transform_2, window_bounds = array<i64: 1, 128>}, {transform_indices = @transform_3, window_bounds = array<i64: 2, 128>}]} {
    %c0 = arith.constant 0 : index
    %c0_0 = arith.constant 0 : index
    %c0_1 = arith.constant 0 : index
    %0 = vector.load %arg2[%c0, %c0_0, %c0_1] : memref<2x32x256xf32, #tpu.memory_space<vmem>>, vector<2x32x128xf32>
    %c0_2 = arith.constant 0 : index
    %c0_3 = arith.constant 0 : index
    %c128 = arith.constant 128 : index
    %1 = vector.load %arg2[%c0_2, %c0_3, %c128] : memref<2x32x256xf32, #tpu.memory_space<vmem>>, vector<2x32x128xf32>
    %2 = arith.addf %0, %1 : vector<2x32x128xf32>
    %c0_i32 = arith.constant 0 : i32
    %3 = arith.cmpi eq, %arg1, %c0_i32 : i32
    %4 = arith.extui %3 : i1 to i32
    %c0_i32_4 = arith.constant 0 : i32
    %5 = arith.cmpi ne, %4, %c0_i32_4 : i32
    scf.if %5 {
      %c0_9 = arith.constant 0 : index
      %c0_10 = arith.constant 0 : index
      %c0_11 = arith.constant 0 : index
      %12 = vector.load %arg6[%c0_9, %c0_10, %c0_11] : memref<2x32x128xf32, #tpu.memory_space<vmem>>, vector<2x32x128xf32>
      tpu.vector_store %arg6[%c0_9, %c0_10, %c0_11], %2 {strides = array<i32>} : memref<2x32x128xf32, #tpu.memory_space<vmem>>, vector<2x32x128xf32>,
    } else {
    }
    %c0_i32_5 = arith.constant 0 : i32
    %6 = arith.cmpi ne, %arg1, %c0_i32_5 : i32
    %7 = arith.extui %6 : i1 to i32
    %c0_i32_6 = arith.constant 0 : i32
    %8 = arith.cmpi ne, %7, %c0_i32_6 : i32
    scf.if %8 {
      %c0_9 = arith.constant 0 : index
      %c0_10 = arith.constant 0 : index
      %c0_11 = arith.constant 0 : index
      %12 = vector.load %arg6[%c0_9, %c0_10, %c0_11] : memref<2x32x128xf32, #tpu.memory_space<vmem>>, vector<2x32x128xf32>
      %13 = arith.addf %12, %2 : vector<2x32x128xf32>
      %c0_12 = arith.constant 0 : index
      %c0_13 = arith.constant 0 : index
      %c0_14 = arith.constant 0 : index
      %14 = vector.load %arg6[%c0_12, %c0_13, %c0_14] : memref<2x32x128xf32, #tpu.memory_space<vmem>>, vector<2x32x128xf32>
      tpu.vector_store %arg6[%c0_12, %c0_13, %c0_14], %13 {strides = array<i32>} : memref<2x32x128xf32, #tpu.memory_space<vmem>>, vector<2x32x128xf32>,
    } else {
    }
    %c0_i32_7 = arith.constant 0 : i32
    %9 = arith.cmpi eq, %arg1, %c0_i32_7 : i32
    %10 = arith.extui %9 : i1 to i32
    %c0_i32_8 = arith.constant 0 : i32
    %11 = arith.cmpi ne, %10, %c0_i32_8 : i32
    scf.if %11 {
      %c0_9 = arith.constant 0 : index
      %c0_10 = arith.constant 0 : index
      %c0_11 = arith.constant 0 : index
      %12 = vector.load %arg6[%c0_9, %c0_10, %c0_11] : memref<2x32x128xf32, #tpu.memory_space<vmem>>, vector<2x32x128xf32>
      %cst = arith.constant dense<0.000000e+00> : vector<2x32xf32>
      %13 = vector.multi_reduction <add>, %12, %cst [2] : vector<2x32x128xf32> to vector<2x32xf32>
      %c0_12 = arith.constant 0 : index
      %c0_13 = arith.constant 0 : index
      %14 = vector.load %arg3[%c0_12, %c0_13] : memref<32x128xf32, #tpu.memory_space<vmem>>, vector<32x128xf32>
      %cst_14 = arith.constant dense<0.000000e+00> : vector<2x128xf32>
      %15 = tpu.matmul %13, %14, %cst_14 {dimension_numbers = #tpu.dot_dimension_numbers<[1], [0], [0], [1], [0, 0, 1, 1], [], []>} : vector<2x32xf32>, vector<32x128xf32>, vector<2x128xf32> -> vector<2x128xf32>
      %c0_15 = arith.constant 0 : index
      %c0_16 = arith.constant 0 : index
      %16 = vector.load %arg4[%c0_15, %c0_16] : memref<1x128xf32, #tpu.memory_space<vmem>>, vector<1x128xf32>
      %17 = vector.broadcast %16 : vector<1x128xf32> to vector<2x128xf32>
      %18 = arith.addf %15, %17 : vector<2x128xf32>
      %c0_17 = arith.constant 0 : index
      %c0_18 = arith.constant 0 : index
      %19 = vector.load %arg5[%c0_17, %c0_18] : memref<2x128xf32, #tpu.memory_space<vmem>>, vector<2x128xf32>
      tpu.vector_store %arg5[%c0_17, %c0_18], %18 {strides = array<i32>} : memref<2x128xf32, #tpu.memory_space<vmem>>, vector<2x128xf32>,
    } else {
    }
    return
  }
  func.func @transform_0(%arg0: i32, %arg1: i32) -> (i32, i32, i32) {
    %c0_i32 = arith.constant 0 : i32
    %c0_i32_0 = arith.constant 0 : i32
    return %arg0, %c0_i32, %arg1 : i32, i32, i32
  }
  func.func @transform_1(%arg0: i32, %arg1: i32) -> (i32, i32) {
    %c0_i32 = arith.constant 0 : i32
    %c0_i32_0 = arith.constant 0 : i32
    %c0_i32_1 = arith.constant 0 : i32
    return %c0_i32, %c0_i32_0 : i32, i32
  }
  func.func @transform_2(%arg0: i32, %arg1: i32) -> (i32, i32) {
    %c0_i32 = arith.constant 0 : i32
    %c0_i32_0 = arith.constant 0 : i32
    %c0_i32_1 = arith.constant 0 : i32
    return %c0_i32, %c0_i32_0 : i32, i32
  }
  func.func @transform_3(%arg0: i32, %arg1: i32) -> (i32, i32) {
    %c0_i32 = arith.constant 0 : i32
    %c0_i32_0 = arith.constant 0 : i32
    return %arg0, %c0_i32 : i32, i32
  }
}

</mosaic_0001>

<bundles_post_ra>
// kernel: tpu_custom_call.1
= control target key start
LH: loop header
LB: loop body
LE: loop exit
PB: predicated region body
PF: predicated region fallthrough
CT: control target
= control target key end

     0   :  { %8 = vsyncpa [#allocation4], 0  ;;  %s466_s0 = inlined_call_operand.hbm [shape: f32[2,32,256], index: 0, kind: input, shape index: {}]   ;;  %s467_s1 = inlined_call_operand.hbm [shape: f32[32,128], index: 1, kind: input, shape index: {}]   ;;  %s468_s2 = inlined_call_operand.vmem [shape: f32[1,128], index: 2, kind: input, shape index: {}]   ;;  %s469_s3 = inlined_call_operand.hbm [shape: f32[2,128], index: 3, kind: output, shape index: {}]  }
   0x1   :  { %9 = vsyncpa [#allocation7], 0 }
   0x2   :  { %10 = vsyncpa [#allocation5], 0  ;;  %s397_s12 = smov [#allocation3]   ;;  %s325_s16 = scalar_lea.hbm %s466_s0, 2048 }
   0x3   :  { %s16_s13 = sshll.u32 %s397_s12, 4  ;;  %p326_p0 = scmp.ne.s32.totalorder %s466_s0, %s325_s16  ;;  %s17_s13 = int_to_ptr.vmem [resolvable:$true] %s16_s13 }
   0x4   :  { %p329_p1 = scmp.lt.u32.totalorder %s325_s16, %s466_s0 }
   0x6   :  { %p331_p2 = pnand %p329_p1, %p326_p0 }
   0x8   :  { %334 = shalt.err (!%p331_p2)
}
   0x9   :  { %s335_s21 = scalar_lea.vmem %s17_s13, 2048  ;;  %p340_p4 = scmp.lt.s32.totalorder %s17_s13, %s17_s13 }
   0xa   :  { %p336_p3 = scmp.ne.s32.totalorder %s17_s13, %s335_s21  ;;  %p341_p5 = scmp.lt.s32.totalorder %s335_s21, %s335_s21 }
   0xc   :  { %p342_p6 = por %p341_p5, %p340_p4 }
   0xe   :  { %p343_p7 = pnand %p342_p6, %p336_p3 }
  0x10   :  { %346 = shalt.err (!%p343_p7)
}
  0x11   :  { %s398_s22 = smov 256   ;;  %s399_s23 = smov 16  }
  0x12   :  { %22 = dma.hbm_to_vmem [thread:$0]  %s466_s0, 2048, %s17_s13, [#allocation4], %s398_s22, %s398_s22, %s399_s23  }
  0x13   :  { %s400_s26 = smov [#allocation6]   ;;  %s347_s30 = scalar_lea.hbm %s467_s1, 512 }
  0x14   :  { %s28_s27 = sshll.u32 %s400_s26, 4  ;;  %p348_p8 = scmp.ne.s32.totalorder %s467_s1, %s347_s30  ;;  %s29_s27 = int_to_ptr.vmem [resolvable:$true] %s28_s27 }
  0x15   :  { %p351_p9 = scmp.lt.u32.totalorder %s347_s30, %s467_s1 }
  0x17   :  { %p353_p10 = pnand %p351_p9, %p348_p8 }
  0x19   :  { %356 = shalt.err (!%p353_p10)
}
  0x1a   :  { %s357_s8 = scalar_lea.vmem %s29_s27, 512  ;;  %p362_p12 = scmp.lt.s32.totalorder %s29_s27, %s29_s27 }
  0x1b   :  { %p358_p11 = scmp.ne.s32.totalorder %s29_s27, %s357_s8  ;;  %p363_p13 = scmp.lt.s32.totalorder %s357_s8, %s357_s8 }
  0x1d   :  { %p364_p0 = por %p363_p13, %p362_p12 }
  0x1f   :  { %p365_p1 = pnand %p364_p0, %p358_p11 }
  0x21   :  { %368 = shalt.err (!%p365_p1)
}
  0x22   :  { %s401_s0 = smov 128   ;;  %s402_s9 = smov 8  }
  0x23   :  { %34 = dma.hbm_to_vmem [thread:$0]  %s467_s1, 512, %s29_s27, [#allocation7], %s401_s0, %s401_s0, %s402_s9  }
  0x24   :  { %391 = dma.done.wait [#allocation4], 2048  }
  0x25   :  { %392 = vsyncadd [#allocation4], 4294965248 }
  0x26   :  { %393 = dma.done.wait [#allocation7], 512  }
  0x27   :  { %394 = vsyncadd [#allocation7], 4294966784  ;;  %v47_v0 = vld [vmem:[#allocation3 + $0x40] sm:$0xff]  ;;  %v55_v1 = vld [vmem:[#allocation3 + $0x48] sm:$0xff]  ;;  %v403_v27 = vmov 0.0|0.0   ;;  %vm404_vm0 = vmmov 0   ;;  %v153_v32 = vlaneseq }
  0x28   :  { %v43_v2 = vld [vmem:[#allocation3] sm:$0xff]  ;;  %v63_v3 = vadd.f32 %v55_v1, %v47_v0  ;;  %v51_v4 = vld [vmem:[#allocation3 + $0x8] sm:$0xff]  ;;  %v48_v5 = vld [vmem:[#allocation3 + $0x50] sm:$0xff]  ;;  %309 = vmatprep.subr.bf16.mxu0 %v403_v27  ;;  %v405_v31 = vmov 0.0   ;;  %vm164_vm1 = vcmask 130112   ;;  %vm171_vm2 = vcmask 195712  }
  0x29   :  { %v56_v6 = vld [vmem:[#allocation3 + $0x58] sm:$0xff]  ;;  %v59_v7 = vadd.f32 %v51_v4, %v43_v2  ;;  %v44_v8 = vld [vmem:[#allocation3 + $0x10] sm:$0xff]  ;;  %v49_v12 = vld [vmem:[#allocation3 + $0x60] sm:$0xff]  ;;  %306 = vmatprep.mubr.msk.f32.mxu0 %vm404_vm0, %v405_v31  ;;  %v154_v33 = vand.u32 127, %v153_v32  ;;  %v156_v38 = vshrl.u32 %v153_v32, 7  ;;  %vm178_vm3 = vcmask 261312  }
  0x2a   :  { %v52_v9 = vld [vmem:[#allocation3 + $0x18] sm:$0xff]  ;;  %126 = vadd.xlane.f32.xlu1 %v63_v3  ;;  %v64_v10 = vadd.f32 %v56_v6, %v48_v5  ;;  %v57_v13 = vld [vmem:[#allocation3 + $0x68] sm:$0xff]  ;;  %v45_v14 = vld [vmem:[#allocation3 + $0x20] sm:$0xff]  ;;  %vm199_vm4 = vcmask 1041409   ;;  %vm201_vm5 = vcmask 261120   ;;  %s406_s13 = smov [#allocation8]  }
  0x2b   :  { %118 = vadd.xlane.f32.xlu0 %v59_v7  ;;  %v60_v11 = vadd.f32 %v52_v9, %v44_v8  ;;  %v53_v15 = vld [vmem:[#allocation3 + $0x28] sm:$0xff]  ;;  %v65_v16 = vadd.f32 %v57_v13, %v49_v12  ;;  %v50_v18 = vld [vmem:[#allocation3 + $0x70] sm:$0xff]  ;;  %v58_v19 = vld [vmem:[#allocation3 + $0x78] sm:$0xff]  ;;  %v159_v36 = vadd.s32 4294967288, %v154_v33  ;;  %v166_v37 = vadd.s32 4294967280, %v154_v33  ;;  %s281_s14 = sshll.u32 %s406_s13, 4  ;;  %s282_s14 = int_to_ptr.vmem [resolvable:$true] %s281_s14 }
  0x2c   :  { %v61_v17 = vadd.f32 %v53_v15, %v45_v14  ;;  %v46_v20 = vld [vmem:[#allocation3 + $0x30] sm:$0xff]  ;;  %v54_v21 = vld [vmem:[#allocation3 + $0x38] sm:$0xff]  ;;  %v66_v22 = vadd.f32 %v58_v19, %v50_v18  ;;  %v134_v24 = vld [vmem:[#allocation6] sm:$0xff]  ;;  %v173_v42 = vadd.s32 4294967272, %v154_v33  ;;  %v157_v44 = vsub.s32 %v154_v33, %v156_v38  ;;  %s369_s15 = scalar_lea.vmem %s282_s14, 32  ;;  %p374_p3 = scmp.lt.s32.totalorder %s282_s14, %s282_s14 }
  0x2d   :  { %v62_v23 = vadd.f32 %v54_v21, %v46_v20  ;;  %v135_v25 = vld [vmem:[#allocation6 + $0x8] sm:$0xff]  ;;  %v136_v28 = vld [vmem:[#allocation6 + $0x10] sm:$0xff]  ;;  %v137_v29 = vld [vmem:[#allocation6 + $0x18] sm:$0xff]  ;;  %v162_v40 = vsub.s32 %v159_v36, %v156_v38  ;;  %v169_v43 = vsub.s32 %v166_v37, %v156_v38  ;;  %p370_p2 = scmp.ne.s32.totalorder %s282_s14, %s369_s15  ;;  %p375_p4 = scmp.lt.s32.totalorder %s369_s15, %s369_s15 }
  0x2e   :  { %128 = vadd.xlane.f32.xlu1 %v64_v10  ;;  %v310_v26 = vpack.c.bf16 %v135_v25, %v134_v24  ;;  %v313_v30 = vpack.c.bf16 %v137_v29, %v136_v28  ;;  %v176_v48 = vsub.s32 %v173_v42, %v156_v38  ;;  %v291_v1 = vld [vmem:[%s468_s2] ss:$0 sm:$0xff] }
  0x2f   :  { %120 = vadd.xlane.f32.xlu0 %v60_v11  ;;  %p376_p5 = por %p375_p4, %p374_p3 }
  0x30   :  { %311 = vmatpush3.bf16.msra.mxu0 %v310_v26 }
  0x31   :  { %312 = vmatprep.subr.bf16.mxu0 %v403_v27  ;;  %p377_p6 = pnand %p376_p5, %p370_p2 }
  0x32   :  { %130 = vadd.xlane.f32.xlu1 %v65_v16 }
  0x33   :  { %122 = vadd.xlane.f32.xlu0 %v61_v17 }
  0x34   :  { %314 = vmatpush3.bf16.msra.mxu0 %v313_v30 }
  0x36   :  { %132 = vadd.xlane.f32.xlu1 %v66_v22 }
  0x37   :  { %124 = vadd.xlane.f32.xlu0 %v62_v23 }
  0xb7   :  { %v127_v34 = vpop.xlane.xlu1 %126 }
  0xb8   :  { %v119_v35 = vpop.xlane.xlu0 %118  ;;  %v183_v51 = vrot.slane %v127_v34, %v157_v44 }
  0xb9   :  { %v158_v53 = vrot.slane %v119_v35, %v157_v44 }
  0xbb   :  { %v129_v39 = vpop.xlane.xlu1 %128 }
  0xbc   :  { %v121_v41 = vpop.xlane.xlu0 %120  ;;  %v187_v46 = vrot.slane %v129_v39, %v162_v40 }
  0xbd   :  { %v163_v49 = vrot.slane %v121_v41, %v162_v40 }
  0xbe   :  { %v188_v55 = vsel %vm164_vm1, %v187_v46, %v183_v51 }
  0xbf   :  { %v131_v45 = vpop.xlane.xlu1 %130  ;;  %v165_v58 = vsel %vm164_vm1, %v163_v49, %v158_v53 }
  0xc0   :  { %v123_v47 = vpop.xlane.xlu0 %122  ;;  %v192_v50 = vrot.slane %v131_v45, %v169_v43 }
  0xc1   :  { %v170_v52 = vrot.slane %v123_v47, %v169_v43 }
  0xc2   :  { %v193_v59 = vsel %vm171_vm2, %v192_v50, %v188_v55 }
  0xc3   :  { %v133_v54 = vpop.xlane.xlu1 %132  ;;  %v172_v61 = vsel %vm171_vm2, %v170_v52, %v165_v58 }
  0xc4   :  { %v197_v56 = vrot.slane %v133_v54, %v176_v48  ;;  %v125_v57 = vpop.xlane.xlu0 %124 }
  0xc5   :  { %v177_v60 = vrot.slane %v125_v57, %v176_v48 }
  0xc6   :  { %v198_v62 = vsel %vm178_vm3, %v197_v56, %v193_v59 }
  0xc7   :  { %v179_v63 = vsel %vm178_vm3, %v177_v60, %v172_v61 }
  0xc8   :  { %v200_v0 = vsel %vm199_vm4, %v198_v62, %v179_v63 }
  0xc9   :  { %307 = vmatmul.mubr.msk.f32.vlgmr.msra.gmra.mrb[0].mxu0 %vm201_vm5, %v200_v0 }
 0x19c   :  { %v270_v2 = vpop.f32.mrb[0].mxu0 }
 0x19d   :  { %v271_v3 = vadd.f32 %v291_v1, %v270_v2  ;;  %v308_v4 = vpop.f32.mrb[1].mxu0 }
 0x19f   :  { %274 = vst [vmem:[#allocation8] sm:$0x3] %v271_v3 }
 0x1a0   :  { %380 = shalt.err (!%p377_p6)
}
 0x1a1   :  { %s381_s18 = scalar_lea.hbm %s469_s3, 32 }
 0x1a2   :  { %p382_p7 = scmp.ne.s32.totalorder %s469_s3, %s381_s18  ;;  %p385_p8 = scmp.lt.u32.totalorder %s381_s18, %s469_s3 }
 0x1a4   :  { %p387_p9 = pnand %p385_p8, %p382_p7 }
 0x1a6   :  { %390 = shalt.err (!%p387_p9)
}
 0x1a7   :  { %284 = dma.vmem_to_hbm [thread:$0]  %s282_s14, 32, %s469_s3, [#allocation5]  }
 0x1a8   :  { %395 = dma.done.wait [#allocation5], 32  }
 0x1a9   :  { %396 = vsyncadd [#allocation5], 4294967264 }
 0x1aa   :  { %288 = vsyncpa [#allocation4], 1 }
 0x1ab   :  { %289 = vsyncpa [#allocation7], 1 }
 0x1ac   :  { %290 = vsyncpa [#allocation5], 1 }

// kernel: tpu_custom_call.1
= control target key start
LH: loop header
LB: loop body
LE: loop exit
PB: predicated region body
PF: predicated region fallthrough
CT: control target
= control target key end

     0   :  { %8 = vsyncpa [#allocation4], 0  ;;  %s466_s0 = inlined_call_operand.hbm [shape: f32[2,32,256], index: 0, kind: input, shape index: {}]   ;;  %s467_s1 = inlined_call_operand.hbm [shape: f32[32,128], index: 1, kind: input, shape index: {}]   ;;  %s468_s2 = inlined_call_operand.vmem [shape: f32[1,128], index: 2, kind: input, shape index: {}]   ;;  %s469_s3 = inlined_call_operand.hbm [shape: f32[2,128], index: 3, kind: output, shape index: {}]  }
   0x1   :  { %9 = vsyncpa [#allocation7], 0 }
   0x2   :  { %10 = vsyncpa [#allocation5], 0  ;;  %s397_s12 = smov [#allocation3]   ;;  %s325_s16 = scalar_lea.hbm %s466_s0, 2048 }
   0x3   :  { %s16_s13 = sshll.u32 %s397_s12, 4  ;;  %p326_p0 = scmp.ne.s32.totalorder %s466_s0, %s325_s16  ;;  %s17_s13 = int_to_ptr.vmem [resolvable:$true] %s16_s13 }
   0x4   :  { %p329_p1 = scmp.lt.u32.totalorder %s325_s16, %s466_s0 }
   0x6   :  { %p331_p2 = pnand %p329_p1, %p326_p0 }
   0x8   :  { %334 = shalt.err (!%p331_p2)
}
   0x9   :  { %s335_s21 = scalar_lea.vmem %s17_s13, 2048  ;;  %p340_p4 = scmp.lt.s32.totalorder %s17_s13, %s17_s13 }
   0xa   :  { %p336_p3 = scmp.ne.s32.totalorder %s17_s13, %s335_s21  ;;  %p341_p5 = scmp.lt.s32.totalorder %s335_s21, %s335_s21 }
   0xc   :  { %p342_p6 = por %p341_p5, %p340_p4 }
   0xe   :  { %p343_p7 = pnand %p342_p6, %p336_p3 }
  0x10   :  { %346 = shalt.err (!%p343_p7)
}
  0x11   :  { %s398_s22 = smov 256   ;;  %s399_s23 = smov 16  }
  0x12   :  { %22 = dma.hbm_to_vmem [thread:$0]  %s466_s0, 2048, %s17_s13, [#allocation4], %s398_s22, %s398_s22, %s399_s23  }
  0x13   :  { %s400_s26 = smov [#allocation6]   ;;  %s347_s30 = scalar_lea.hbm %s467_s1, 512 }
  0x14   :  { %s28_s27 = sshll.u32 %s400_s26, 4  ;;  %p348_p8 = scmp.ne.s32.totalorder %s467_s1, %s347_s30  ;;  %s29_s27 = int_to_ptr.vmem [resolvable:$true] %s28_s27 }
  0x15   :  { %p351_p9 = scmp.lt.u32.totalorder %s347_s30, %s467_s1 }
  0x17   :  { %p353_p10 = pnand %p351_p9, %p348_p8 }
  0x19   :  { %356 = shalt.err (!%p353_p10)
}
  0x1a   :  { %s357_s8 = scalar_lea.vmem %s29_s27, 512  ;;  %p362_p12 = scmp.lt.s32.totalorder %s29_s27, %s29_s27 }
  0x1b   :  { %p358_p11 = scmp.ne.s32.totalorder %s29_s27, %s357_s8  ;;  %p363_p13 = scmp.lt.s32.totalorder %s357_s8, %s357_s8 }
  0x1d   :  { %p364_p0 = por %p363_p13, %p362_p12 }
  0x1f   :  { %p365_p1 = pnand %p364_p0, %p358_p11 }
  0x21   :  { %368 = shalt.err (!%p365_p1)
}
  0x22   :  { %s401_s0 = smov 128   ;;  %s402_s9 = smov 8  }
  0x23   :  { %34 = dma.hbm_to_vmem [thread:$0]  %s467_s1, 512, %s29_s27, [#allocation7], %s401_s0, %s401_s0, %s402_s9  }
  0x24   :  { %391 = dma.done.wait [#allocation4], 2048  }
  0x25   :  { %392 = vsyncadd [#allocation4], 4294965248 }
  0x26   :  { %393 = dma.done.wait [#allocation7], 512  }
  0x27   :  { %394 = vsyncadd [#allocation7], 4294966784  ;;  %v47_v0 = vld [vmem:[#allocation3 + $0x40] sm:$0xff]  ;;  %v55_v1 = vld [vmem:[#allocation3 + $0x48] sm:$0xff]  ;;  %v403_v27 = vmov 0.0|0.0   ;;  %vm404_vm0 = vmmov 0   ;;  %v153_v32 = vlaneseq }
  0x28   :  { %v43_v2 = vld [vmem:[#allocation3] sm:$0xff]  ;;  %v63_v3 = vadd.f32 %v55_v1, %v47_v0  ;;  %v51_v4 = vld [vmem:[#allocation3 + $0x8] sm:$0xff]  ;;  %v48_v5 = vld [vmem:[#allocation3 + $0x50] sm:$0xff]  ;;  %309 = vmatprep.subr.bf16.mxu0 %v403_v27  ;;  %v405_v31 = vmov 0.0   ;;  %vm164_vm1 = vcmask 130112   ;;  %vm171_vm2 = vcmask 195712  }
  0x29   :  { %v56_v6 = vld [vmem:[#allocation3 + $0x58] sm:$0xff]  ;;  %v59_v7 = vadd.f32 %v51_v4, %v43_v2  ;;  %v44_v8 = vld [vmem:[#allocation3 + $0x10] sm:$0xff]  ;;  %v49_v12 = vld [vmem:[#allocation3 + $0x60] sm:$0xff]  ;;  %306 = vmatprep.mubr.msk.f32.mxu0 %vm404_vm0, %v405_v31  ;;  %v154_v33 = vand.u32 127, %v153_v32  ;;  %v156_v38 = vshrl.u32 %v153_v32, 7  ;;  %vm178_vm3 = vcmask 261312  }
  0x2a   :  { %v52_v9 = vld [vmem:[#allocation3 + $0x18] sm:$0xff]  ;;  %126 = vadd.xlane.f32.xlu1 %v63_v3  ;;  %v64_v10 = vadd.f32 %v56_v6, %v48_v5  ;;  %v57_v13 = vld [vmem:[#allocation3 + $0x68] sm:$0xff]  ;;  %v45_v14 = vld [vmem:[#allocation3 + $0x20] sm:$0xff]  ;;  %vm199_vm4 = vcmask 1041409   ;;  %vm201_vm5 = vcmask 261120   ;;  %s406_s13 = smov [#allocation8]  }
  0x2b   :  { %118 = vadd.xlane.f32.xlu0 %v59_v7  ;;  %v60_v11 = vadd.f32 %v52_v9, %v44_v8  ;;  %v53_v15 = vld [vmem:[#allocation3 + $0x28] sm:$0xff]  ;;  %v65_v16 = vadd.f32 %v57_v13, %v49_v12  ;;  %v50_v18 = vld [vmem:[#allocation3 + $0x70] sm:$0xff]  ;;  %v58_v19 = vld [vmem:[#allocation3 + $0x78] sm:$0xff]  ;;  %v159_v36 = vadd.s32 4294967288, %v154_v33  ;;  %v166_v37 = vadd.s32 4294967280, %v154_v33  ;;  %s281_s14 = sshll.u32 %s406_s13, 4  ;;  %s282_s14 = int_to_ptr.vmem [resolvable:$true] %s281_s14 }
  0x2c   :  { %v61_v17 = vadd.f32 %v53_v15, %v45_v14  ;;  %v46_v20 = vld [vmem:[#allocation3 + $0x30] sm:$0xff]  ;;  %v54_v21 = vld [vmem:[#allocation3 + $0x38] sm:$0xff]  ;;  %v66_v22 = vadd.f32 %v58_v19, %v50_v18  ;;  %v134_v24 = vld [vmem:[#allocation6] sm:$0xff]  ;;  %v173_v42 = vadd.s32 4294967272, %v154_v33  ;;  %v157_v44 = vsub.s32 %v154_v33, %v156_v38  ;;  %s369_s15 = scalar_lea.vmem %s282_s14, 32  ;;  %p374_p3 = scmp.lt.s32.totalorder %s282_s14, %s282_s14 }
  0x2d   :  { %v62_v23 = vadd.f32 %v54_v21, %v46_v20  ;;  %v135_v25 = vld [vmem:[#allocation6 + $0x8] sm:$0xff]  ;;  %v136_v28 = vld [vmem:[#allocation6 + $0x10] sm:$0xff]  ;;  %v137_v29 = vld [vmem:[#allocation6 + $0x18] sm:$0xff]  ;;  %v162_v40 = vsub.s32 %v159_v36, %v156_v38  ;;  %v169_v43 = vsub.s32 %v166_v37, %v156_v38  ;;  %p370_p2 = scmp.ne.s32.totalorder %s282_s14, %s369_s15  ;;  %p375_p4 = scmp.lt.s32.totalorder %s369_s15, %s369_s15 }
  0x2e   :  { %128 = vadd.xlane.f32.xlu1 %v64_v10  ;;  %v310_v26 = vpack.c.bf16 %v135_v25, %v134_v24  ;;  %v313_v30 = vpack.c.bf16 %v137_v29, %v136_v28  ;;  %v176_v48 = vsub.s32 %v173_v42, %v156_v38  ;;  %v291_v1 = vld [vmem:[%s468_s2] ss:$0 sm:$0xff] }
  0x2f   :  { %120 = vadd.xlane.f32.xlu0 %v60_v11  ;;  %p376_p5 = por %p375_p4, %p374_p3 }
  0x30   :  { %311 = vmatpush3.bf16.msra.mxu0 %v310_v26 }
  0x31   :  { %312 = vmatprep.subr.bf16.mxu0 %v403_v27  ;;  %p377_p6 = pnand %p376_p5, %p370_p2 }
  0x32   :  { %130 = vadd.xlane.f32.xlu1 %v65_v16 }
  0x33   :  { %122 = vadd.xlane.f32.xlu0 %v61_v17 }
  0x34   :  { %314 = vmatpush3.bf16.msra.mxu0 %v313_v30 }
  0x36   :  { %132 = vadd.xlane.f32.xlu1 %v66_v22 }
  0x37   :  { %124 = vadd.xlane.f32.xlu0 %v62_v23 }
  0xb7   :  { %v127_v34 = vpop.xlane.xlu1 %126 }
  0xb8   :  { %v119_v35 = vpop.xlane.xlu0 %118  ;;  %v183_v51 = vrot.slane %v127_v34, %v157_v44 }
  0xb9   :  { %v158_v53 = vrot.slane %v119_v35, %v157_v44 }
  0xbb   :  { %v129_v39 = vpop.xlane.xlu1 %128 }
  0xbc   :  { %v121_v41 = vpop.xlane.xlu0 %120  ;;  %v187_v46 = vrot.slane %v129_v39, %v162_v40 }
  0xbd   :  { %v163_v49 = vrot.slane %v121_v41, %v162_v40 }
  0xbe   :  { %v188_v55 = vsel %vm164_vm1, %v187_v46, %v183_v51 }
  0xbf   :  { %v131_v45 = vpop.xlane.xlu1 %130  ;;  %v165_v58 = vsel %vm164_vm1, %v163_v49, %v158_v53 }
  0xc0   :  { %v123_v47 = vpop.xlane.xlu0 %122  ;;  %v192_v50 = vrot.slane %v131_v45, %v169_v43 }
  0xc1   :  { %v170_v52 = vrot.slane %v123_v47, %v169_v43 }
  0xc2   :  { %v193_v59 = vsel %vm171_vm2, %v192_v50, %v188_v55 }
  0xc3   :  { %v133_v54 = vpop.xlane.xlu1 %132  ;;  %v172_v61 = vsel %vm171_vm2, %v170_v52, %v165_v58 }
  0xc4   :  { %v197_v56 = vrot.slane %v133_v54, %v176_v48  ;;  %v125_v57 = vpop.xlane.xlu0 %124 }
  0xc5   :  { %v177_v60 = vrot.slane %v125_v57, %v176_v48 }
  0xc6   :  { %v198_v62 = vsel %vm178_vm3, %v197_v56, %v193_v59 }
  0xc7   :  { %v179_v63 = vsel %vm178_vm3, %v177_v60, %v172_v61 }
  0xc8   :  { %v200_v0 = vsel %vm199_vm4, %v198_v62, %v179_v63 }
  0xc9   :  { %307 = vmatmul.mubr.msk.f32.vlgmr.msra.gmra.mrb[0].mxu0 %vm201_vm5, %v200_v0 }
 0x19c   :  { %v270_v2 = vpop.f32.mrb[0].mxu0 }
 0x19d   :  { %v271_v3 = vadd.f32 %v291_v1, %v270_v2  ;;  %v308_v4 = vpop.f32.mrb[1].mxu0 }
 0x19f   :  { %274 = vst [vmem:[#allocation8] sm:$0x3] %v271_v3 }
 0x1a0   :  { %380 = shalt.err (!%p377_p6)
}
 0x1a1   :  { %s381_s18 = scalar_lea.hbm %s469_s3, 32 }
 0x1a2   :  { %p382_p7 = scmp.ne.s32.totalorder %s469_s3, %s381_s18  ;;  %p385_p8 = scmp.lt.u32.totalorder %s381_s18, %s469_s3 }
 0x1a4   :  { %p387_p9 = pnand %p385_p8, %p382_p7 }
 0x1a6   :  { %390 = shalt.err (!%p387_p9)
}
 0x1a7   :  { %284 = dma.vmem_to_hbm [thread:$0]  %s282_s14, 32, %s469_s3, [#allocation5]  }
 0x1a8   :  { %395 = dma.done.wait [#allocation5], 32  }
 0x1a9   :  { %396 = vsyncadd [#allocation5], 4294967264 }
 0x1aa   :  { %288 = vsyncpa [#allocation4], 1 }
 0x1ab   :  { %289 = vsyncpa [#allocation7], 1 }
 0x1ac   :  { %290 = vsyncpa [#allocation5], 1 }

</bundles_post_ra>
